<compile_context>
chip_gen: v5e
topology: v5e:2x2
jax: 0.10.0
libtpu: 0.0.40
codegen_flags: <defaults>
</compile_context>

<pallas_src>
import functools

import jax
import jax.numpy as jnp
from jax.experimental import pallas as pl
from jax.experimental.pallas import tpu as pltpu


def _dilated_conv_relu_kernel(x_ref, w_ref, b_ref, o_ref, *,
                              H, W, K, dilation, pad_lo, BT):
    """Dilated 'same' conv + bias + ReLU for BT batch items, fully in registers.

    x_ref : (BT, Cin, H*W)   flattened NCHW inputs for this grid step
    w_ref : (Cout, K*K*Cin)  weights, tap-major / channel-minor
    b_ref : (Cout, 1)        bias
    o_ref : (BT, Cout, H*W)  lane-dense output (free reshape to NCHW outside)
    """
    HW = H * W
    Cin = x_ref.shape[1]

    # Hoisted per-position validity masks (shared by every tap and batch item).
    # pos = h*W + w.  Row test "0 <= h+dh < H" is the range test
    # "-dh*W <= pos < (H-dh)*W" (no integer division needed).
    pos = jax.lax.broadcasted_iota(jnp.int32, (Cin, HW), 1)
    col = pos % W
    dhs = [kh * dilation - pad_lo for kh in range(K)]
    dws = [kw * dilation - pad_lo for kw in range(K)]
    h_ok = [(pos >= -dh * W) & (pos < (H - dh) * W) for dh in dhs]
    w_ok = [(col >= -dw) & (col < W - dw) for dw in dws]

    # Doubled image [x | x]: a length-HW window starting at (off % HW) equals
    # x[pos + off] at every *valid* position (invalid positions wrap into the other
    # copy / adjacent rows and are masked to zero below), so every tap is a static
    # lane slice — no padded scratch buffer and no stores.
    xx = [jnp.concatenate([x_ref[b].astype(jnp.float32)] * 2, axis=1)
          for b in range(BT)]

    # im2col RHS, built in registers: rows = (tap, channel), cols = (batch, position).
    rows = []
    for kh in range(K):
        for kw in range(K):
            dh, dw = dhs[kh], dws[kw]
            off = dh * W + dw
            s = off % HW
            center = (dh == 0 and dw == 0)
            valid = None if center else (h_ok[kh] & w_ok[kw])
            parts = []
            for b in range(BT):
                tap = xx[b][:, s:s + HW]          # (Cin, HW) static lane slice
                if not center:
                    tap = jnp.where(valid, tap, 0.0)
                parts.append(tap)
            rows.append(parts[0] if BT == 1 else jnp.concatenate(parts, axis=1))
    rhs = rows[0] if len(rows) == 1 else jnp.concatenate(rows, axis=0)  # (K*K*Cin, BT*HW)

    # One MXU matmul for all BT images: (Cout, K*K*Cin) x (K*K*Cin, BT*HW).
    acc = jnp.dot(w_ref[...], rhs, preferred_element_type=jnp.float32)
    acc = jnp.maximum(acc + b_ref[...], 0.0)                 # bias (Cout,1) broadcast

    # HW is a multiple of 128 here, so each slab slice is lane-aligned and the
    # stores stay unmasked (lane-dense output rule).
    for b in range(BT):
        o_ref[b] = acc[:, b * HW:(b + 1) * HW].astype(o_ref.dtype)


def prepare_dilated_layer_params(weight_oihw, bias):
    """Torch (Cout, Cin, K, K) weight -> (Cout, K*K*Cin) tap-major / channel-minor.

    Call once, outside the per-call jitted path (weights are static for inference).
    """
    Cout, Cin, K, _ = weight_oihw.shape
    w2 = jnp.transpose(weight_oihw, (0, 2, 3, 1)).reshape(Cout, K * K * Cin)
    b2 = bias.reshape(Cout, 1)
    return w2, b2


def _pick_batch_tile(B):
    """Fold the whole batch into one grid step (amortizes ~0.35us/step), except keep
    two grid steps on 2-TensorCore chips (v7x) so both cores get work."""
    try:
        kind = jax.devices()[0].device_kind.lower()
    except Exception:
        kind = ""
    n_steps = 2 if "v7" in kind else 1
    if n_steps > 1 and B % n_steps == 0:
        return B // n_steps
    return B


def dilated_layer_forward(x_nchw, w2, b2, *, kernel_size, dilation, batch_tile=None):
    """Inference forward of DilatedLayer: ReLU(conv2d(x, padding='same', dilation)).

    Dropout2d is the identity in eval mode.
    """
    B, Cin, H, W = x_nchw.shape
    Cout = w2.shape[0]
    HW = H * W
    K = kernel_size
    total_pad = dilation * (K - 1)
    pad_lo = total_pad // 2           # PyTorch padding='same' split: lo = total // 2

    BT = _pick_batch_tile(B) if batch_tile is None else batch_tile
    assert B % BT == 0, (B, BT)
    steps = B // BT

    x_flat = x_nchw.reshape(B, Cin, HW)     # layout-free reshape, no HBM transpose

    kernel = functools.partial(_dilated_conv_relu_kernel,
                               H=H, W=W, K=K, dilation=dilation,
                               pad_lo=pad_lo, BT=BT)

    out_flat = pl.pallas_call(
        kernel,
        out_shape=jax.ShapeDtypeStruct((B, Cout, HW), x_nchw.dtype),
        grid_spec=pltpu.PrefetchScalarGridSpec(
            num_scalar_prefetch=0,
            grid=(steps,),
            in_specs=[
                pl.BlockSpec((BT, Cin, HW), lambda i: (i, 0, 0)),
                pl.BlockSpec((Cout, K * K * Cin), lambda i: (0, 0)),
                pl.BlockSpec((Cout, 1), lambda i: (0, 0)),
            ],
            out_specs=pl.BlockSpec((BT, Cout, HW), lambda i: (i, 0, 0)),
        ),
        # At production resolutions, tile HW into lane blocks (multiples of 128) and
        # set vmem_limit_bytes here (in-register RHS scales as K*K*Cin*BT*HW*4 B;
        # v7x has only 64 MiB VMEM).
        compiler_params=pltpu.CompilerParams(dimension_semantics=("parallel",)),
    )(x_flat, w2, b2)

    # TODO(synk): training-mode Dropout2d (per-channel Bernoulli mask scaled by
    # 1/(1-p)) is not implemented; inference mode is the identity.
    # Free reshape: (B, Cout, H*W) is already NCHW-ordered.
    return out_flat.reshape(B, Cout, H, W)


def _reference(x_nchw, weight, bias, *, dilation):
    """Pure-JAX reference matching F.relu(conv2d(..., padding='same'))."""
    K = weight.shape[-1]
    total_pad = dilation * (K - 1)
    pad_lo = total_pad // 2
    pad_hi = total_pad - pad_lo
    y = jax.lax.conv_general_dilated(
        x_nchw, weight,
        window_strides=(1, 1),
        padding=((pad_lo, pad_hi), (pad_lo, pad_hi)),
        rhs_dilation=(dilation, dilation),
        dimension_numbers=("NCHW", "OIHW", "NCHW"),
    )
    return jnp.maximum(y + bias[None, :, None, None], 0.0)


if __name__ == "__main__":
    # Module config (synthetic, deterministic init).
    in_channels, out_channels = 4, 8
    kernel_size, dilation, dropout_rate = 3, 2, 0.1

    key = jax.random.PRNGKey(0)
    kx, kw, kb = jax.random.split(key, 3)

    x = jax.random.normal(kx, (2, in_channels, 16, 16), dtype=jnp.float32)
    weight = 0.1 * jax.random.normal(
        kw, (out_channels, in_channels, kernel_size, kernel_size), dtype=jnp.float32)
    bias = 0.1 * jax.random.normal(kb, (out_channels,), dtype=jnp.float32)

    # One-time weight/bias relayout, outside the per-call jitted path.
    w2, b2 = prepare_dilated_layer_params(weight, bias)

    fwd = jax.jit(functools.partial(dilated_layer_forward,
                                    kernel_size=kernel_size, dilation=dilation))
    out = jax.block_until_ready(fwd(x, w2, b2))

    ref = _reference(x, weight, bias, dilation=dilation)
    assert out.shape == ref.shape == (2, out_channels, 16, 16)
    assert jnp.allclose(out, ref, atol=1e-5, rtol=1e-5), "mismatch vs reference conv"

    print("KERNEL_OK")
</pallas_src>

<mosaic_0001>
module attributes {stable_mosaic.version = 11 : i64} {
  func.func @_dilated_conv_relu_kernel(%arg0: i32, %arg1: memref<2x4x256xf32, #tpu.memory_space<vmem>>, %arg2: memref<8x36xf32, #tpu.memory_space<vmem>>, %arg3: memref<8x1xf32, #tpu.memory_space<vmem>>, %arg4: memref<2x8x256xf32, #tpu.memory_space<vmem>>) attributes {dimension_semantics = [#tpu.dimension_semantics<parallel>], iteration_bounds = array<i64: 1>, scalar_prefetch = 0 : i64, scratch_operands = 0 : i64, tpu.core_type = #tpu.core_type<tc>, window_params = [{transform_indices = @transform_0, window_bounds = array<i64: 2, 4, 256>}, {pipeline_mode = #tpu.pipeline_mode<synchronous>, transform_indices = @transform_1, window_bounds = array<i64: 8, 36>}, {pipeline_mode = #tpu.pipeline_mode<synchronous>, transform_indices = @transform_2, window_bounds = array<i64: 8, 1>}, {transform_indices = @transform_3, window_bounds = array<i64: 2, 8, 256>}]} {
    %0 = tpu.iota {dimensions = array<i32: 1>} : vector<4x256xi32>
    %c16_i32 = arith.constant 16 : i32
    %c0_i32 = arith.constant 0 : i32
    %1 = arith.cmpi eq, %c16_i32, %c0_i32 : i32
    %c1_i32 = arith.constant 1 : i32
    %2 = arith.select %1, %c1_i32, %c16_i32 : i32
    %3 = vector.broadcast %2 : i32 to vector<4x256xi32>
    %4 = arith.remsi %0, %3 : vector<4x256xi32>
    %c0_i32_0 = arith.constant 0 : i32
    %5 = vector.broadcast %c0_i32_0 : i32 to vector<4x256xi32>
    %6 = arith.cmpi ne, %4, %5 : vector<4x256xi32>
    %c0_i32_1 = arith.constant 0 : i32
    %7 = vector.broadcast %c0_i32_1 : i32 to vector<4x256xi32>
    %8 = arith.cmpi slt, %4, %7 : vector<4x256xi32>
    %c0_i32_2 = arith.constant 0 : i32
    %9 = arith.cmpi slt, %2, %c0_i32_2 : i32
    %10 = vector.broadcast %9 : i1 to vector<4x256xi1>
    %11 = vector.broadcast %10 : vector<4x256xi1> to vector<4x256xi1>
    %12 = arith.xori %8, %11 : vector<4x256xi1>
    %13 = arith.andi %12, %6 : vector<4x256xi1>
    %14 = vector.broadcast %2 : i32 to vector<4x256xi32>
    %15 = arith.addi %4, %14 : vector<4x256xi32>
    %16 = arith.select %13, %15, %4 : vector<4x256xi1>, vector<4x256xi32>
    %c32_i32 = arith.constant 32 : i32
    %17 = vector.broadcast %c32_i32 : i32 to vector<4x256xi32>
    %18 = arith.cmpi sge, %0, %17 : vector<4x256xi32>
    %c288_i32 = arith.constant 288 : i32
    %19 = vector.broadcast %c288_i32 : i32 to vector<4x256xi32>
    %20 = arith.cmpi slt, %0, %19 : vector<4x256xi32>
    %21 = arith.andi %18, %20 : vector<4x256xi1>
    %c0_i32_3 = arith.constant 0 : i32
    %22 = vector.broadcast %c0_i32_3 : i32 to vector<4x256xi32>
    %23 = arith.cmpi sge, %0, %22 : vector<4x256xi32>
    %c256_i32 = arith.constant 256 : i32
    %24 = vector.broadcast %c256_i32 : i32 to vector<4x256xi32>
    %25 = arith.cmpi slt, %0, %24 : vector<4x256xi32>
    %26 = arith.andi %23, %25 : vector<4x256xi1>
    %c-32_i32 = arith.constant -32 : i32
    %27 = vector.broadcast %c-32_i32 : i32 to vector<4x256xi32>
    %28 = arith.cmpi sge, %0, %27 : vector<4x256xi32>
    %c224_i32 = arith.constant 224 : i32
    %29 = vector.broadcast %c224_i32 : i32 to vector<4x256xi32>
    %30 = arith.cmpi slt, %0, %29 : vector<4x256xi32>
    %31 = arith.andi %28, %30 : vector<4x256xi1>
    %c2_i32 = arith.constant 2 : i32
    %32 = vector.broadcast %c2_i32 : i32 to vector<4x256xi32>
    %33 = arith.cmpi sge, %16, %32 : vector<4x256xi32>
    %c18_i32 = arith.constant 18 : i32
    %34 = vector.broadcast %c18_i32 : i32 to vector<4x256xi32>
    %35 = arith.cmpi slt, %16, %34 : vector<4x256xi32>
    %36 = arith.andi %33, %35 : vector<4x256xi1>
    %c0_i32_4 = arith.constant 0 : i32
    %37 = vector.broadcast %c0_i32_4 : i32 to vector<4x256xi32>
    %38 = arith.cmpi sge, %16, %37 : vector<4x256xi32>
    %c16_i32_5 = arith.constant 16 : i32
    %39 = vector.broadcast %c16_i32_5 : i32 to vector<4x256xi32>
    %40 = arith.cmpi slt, %16, %39 : vector<4x256xi32>
    %41 = arith.andi %38, %40 : vector<4x256xi1>
    %c-2_i32 = arith.constant -2 : i32
    %42 = vector.broadcast %c-2_i32 : i32 to vector<4x256xi32>
    %43 = arith.cmpi sge, %16, %42 : vector<4x256xi32>
    %c14_i32 = arith.constant 14 : i32
    %44 = vector.broadcast %c14_i32 : i32 to vector<4x256xi32>
    %45 = arith.cmpi slt, %16, %44 : vector<4x256xi32>
    %46 = arith.andi %43, %45 : vector<4x256xi1>
    %c0 = arith.constant 0 : index
    %c0_6 = arith.constant 0 : index
    %c0_7 = arith.constant 0 : index
    %47 = vector.load %arg1[%c0, %c0_6, %c0_7] : memref<2x4x256xf32, #tpu.memory_space<vmem>>, vector<1x4x256xf32>
    %48 = vector.shape_cast %47 : vector<1x4x256xf32> to vector<4x256xf32>
    %49 = tpu.concatenate %48, %48 in 1 : vector<4x256xf32>, vector<4x256xf32> -> vector<4x512xf32>
    %c1 = arith.constant 1 : index
    %c0_8 = arith.constant 0 : index
    %c0_9 = arith.constant 0 : index
    %50 = vector.load %arg1[%c1, %c0_8, %c0_9] : memref<2x4x256xf32, #tpu.memory_space<vmem>>, vector<1x4x256xf32>
    %51 = vector.shape_cast %50 : vector<1x4x256xf32> to vector<4x256xf32>
    %52 = tpu.concatenate %51, %51 in 1 : vector<4x256xf32>, vector<4x256xf32> -> vector<4x512xf32>
    %53 = arith.andi %21, %36 : vector<4x256xi1>
    %54 = vector.extract_strided_slice %49 {offsets = [0, 222], sizes = [4, 256], strides = [1, 1]} : vector<4x512xf32> to vector<4x256xf32>
    %cst = arith.constant 0.000000e+00 : f32
    %55 = vector.broadcast %cst : f32 to vector<4x256xf32>
    %56 = arith.select %53, %54, %55 : vector<4x256xi1>, vector<4x256xf32>
    %57 = vector.extract_strided_slice %52 {offsets = [0, 222], sizes = [4, 256], strides = [1, 1]} : vector<4x512xf32> to vector<4x256xf32>
    %cst_10 = arith.constant 0.000000e+00 : f32
    %58 = vector.broadcast %cst_10 : f32 to vector<4x256xf32>
    %59 = arith.select %53, %57, %58 : vector<4x256xi1>, vector<4x256xf32>
    %60 = tpu.concatenate %56, %59 in 1 : vector<4x256xf32>, vector<4x256xf32> -> vector<4x512xf32>
    %61 = arith.andi %21, %41 : vector<4x256xi1>
    %62 = vector.extract_strided_slice %49 {offsets = [0, 224], sizes = [4, 256], strides = [1, 1]} : vector<4x512xf32> to vector<4x256xf32>
    %cst_11 = arith.constant 0.000000e+00 : f32
    %63 = vector.broadcast %cst_11 : f32 to vector<4x256xf32>
    %64 = arith.select %61, %62, %63 : vector<4x256xi1>, vector<4x256xf32>
    %65 = vector.extract_strided_slice %52 {offsets = [0, 224], sizes = [4, 256], strides = [1, 1]} : vector<4x512xf32> to vector<4x256xf32>
    %cst_12 = arith.constant 0.000000e+00 : f32
    %66 = vector.broadcast %cst_12 : f32 to vector<4x256xf32>
    %67 = arith.select %61, %65, %66 : vector<4x256xi1>, vector<4x256xf32>
    %68 = tpu.concatenate %64, %67 in 1 : vector<4x256xf32>, vector<4x256xf32> -> vector<4x512xf32>
    %69 = arith.andi %21, %46 : vector<4x256xi1>
    %70 = vector.extract_strided_slice %49 {offsets = [0, 226], sizes = [4, 256], strides = [1, 1]} : vector<4x512xf32> to vector<4x256xf32>
    %cst_13 = arith.constant 0.000000e+00 : f32
    %71 = vector.broadcast %cst_13 : f32 to vector<4x256xf32>
    %72 = arith.select %69, %70, %71 : vector<4x256xi1>, vector<4x256xf32>
    %73 = vector.extract_strided_slice %52 {offsets = [0, 226], sizes = [4, 256], strides = [1, 1]} : vector<4x512xf32> to vector<4x256xf32>
    %cst_14 = arith.constant 0.000000e+00 : f32
    %74 = vector.broadcast %cst_14 : f32 to vector<4x256xf32>
    %75 = arith.select %69, %73, %74 : vector<4x256xi1>, vector<4x256xf32>
    %76 = tpu.concatenate %72, %75 in 1 : vector<4x256xf32>, vector<4x256xf32> -> vector<4x512xf32>
    %77 = arith.andi %26, %36 : vector<4x256xi1>
    %78 = vector.extract_strided_slice %49 {offsets = [0, 254], sizes = [4, 256], strides = [1, 1]} : vector<4x512xf32> to vector<4x256xf32>
    %cst_15 = arith.constant 0.000000e+00 : f32
    %79 = vector.broadcast %cst_15 : f32 to vector<4x256xf32>
    %80 = arith.select %77, %78, %79 : vector<4x256xi1>, vector<4x256xf32>
    %81 = vector.extract_strided_slice %52 {offsets = [0, 254], sizes = [4, 256], strides = [1, 1]} : vector<4x512xf32> to vector<4x256xf32>
    %cst_16 = arith.constant 0.000000e+00 : f32
    %82 = vector.broadcast %cst_16 : f32 to vector<4x256xf32>
    %83 = arith.select %77, %81, %82 : vector<4x256xi1>, vector<4x256xf32>
    %84 = tpu.concatenate %80, %83 in 1 : vector<4x256xf32>, vector<4x256xf32> -> vector<4x512xf32>
    %85 = vector.extract_strided_slice %49 {offsets = [0, 0], sizes = [4, 256], strides = [1, 1]} : vector<4x512xf32> to vector<4x256xf32>
    %86 = vector.extract_strided_slice %52 {offsets = [0, 0], sizes = [4, 256], strides = [1, 1]} : vector<4x512xf32> to vector<4x256xf32>
    %87 = tpu.concatenate %85, %86 in 1 : vector<4x256xf32>, vector<4x256xf32> -> vector<4x512xf32>
    %88 = arith.andi %26, %46 : vector<4x256xi1>
    %89 = vector.extract_strided_slice %49 {offsets = [0, 2], sizes = [4, 256], strides = [1, 1]} : vector<4x512xf32> to vector<4x256xf32>
    %cst_17 = arith.constant 0.000000e+00 : f32
    %90 = vector.broadcast %cst_17 : f32 to vector<4x256xf32>
    %91 = arith.select %88, %89, %90 : vector<4x256xi1>, vector<4x256xf32>
    %92 = vector.extract_strided_slice %52 {offsets = [0, 2], sizes = [4, 256], strides = [1, 1]} : vector<4x512xf32> to vector<4x256xf32>
    %cst_18 = arith.constant 0.000000e+00 : f32
    %93 = vector.broadcast %cst_18 : f32 to vector<4x256xf32>
    %94 = arith.select %88, %92, %93 : vector<4x256xi1>, vector<4x256xf32>
    %95 = tpu.concatenate %91, %94 in 1 : vector<4x256xf32>, vector<4x256xf32> -> vector<4x512xf32>
    %96 = arith.andi %31, %36 : vector<4x256xi1>
    %97 = vector.extract_strided_slice %49 {offsets = [0, 30], sizes = [4, 256], strides = [1, 1]} : vector<4x512xf32> to vector<4x256xf32>
    %cst_19 = arith.constant 0.000000e+00 : f32
    %98 = vector.broadcast %cst_19 : f32 to vector<4x256xf32>
    %99 = arith.select %96, %97, %98 : vector<4x256xi1>, vector<4x256xf32>
    %100 = vector.extract_strided_slice %52 {offsets = [0, 30], sizes = [4, 256], strides = [1, 1]} : vector<4x512xf32> to vector<4x256xf32>
    %cst_20 = arith.constant 0.000000e+00 : f32
    %101 = vector.broadcast %cst_20 : f32 to vector<4x256xf32>
    %102 = arith.select %96, %100, %101 : vector<4x256xi1>, vector<4x256xf32>
    %103 = tpu.concatenate %99, %102 in 1 : vector<4x256xf32>, vector<4x256xf32> -> vector<4x512xf32>
    %104 = arith.andi %31, %41 : vector<4x256xi1>
    %105 = vector.extract_strided_slice %49 {offsets = [0, 32], sizes = [4, 256], strides = [1, 1]} : vector<4x512xf32> to vector<4x256xf32>
    %cst_21 = arith.constant 0.000000e+00 : f32
    %106 = vector.broadcast %cst_21 : f32 to vector<4x256xf32>
    %107 = arith.select %104, %105, %106 : vector<4x256xi1>, vector<4x256xf32>
    %108 = vector.extract_strided_slice %52 {offsets = [0, 32], sizes = [4, 256], strides = [1, 1]} : vector<4x512xf32> to vector<4x256xf32>
    %cst_22 = arith.constant 0.000000e+00 : f32
    %109 = vector.broadcast %cst_22 : f32 to vector<4x256xf32>
    %110 = arith.select %104, %108, %109 : vector<4x256xi1>, vector<4x256xf32>
    %111 = tpu.concatenate %107, %110 in 1 : vector<4x256xf32>, vector<4x256xf32> -> vector<4x512xf32>
    %112 = arith.andi %31, %46 : vector<4x256xi1>
    %113 = vector.extract_strided_slice %49 {offsets = [0, 34], sizes = [4, 256], strides = [1, 1]} : vector<4x512xf32> to vector<4x256xf32>
    %cst_23 = arith.constant 0.000000e+00 : f32
    %114 = vector.broadcast %cst_23 : f32 to vector<4x256xf32>
    %115 = arith.select %112, %113, %114 : vector<4x256xi1>, vector<4x256xf32>
    %116 = vector.extract_strided_slice %52 {offsets = [0, 34], sizes = [4, 256], strides = [1, 1]} : vector<4x512xf32> to vector<4x256xf32>
    %cst_24 = arith.constant 0.000000e+00 : f32
    %117 = vector.broadcast %cst_24 : f32 to vector<4x256xf32>
    %118 = arith.select %112, %116, %117 : vector<4x256xi1>, vector<4x256xf32>
    %119 = tpu.concatenate %115, %118 in 1 : vector<4x256xf32>, vector<4x256xf32> -> vector<4x512xf32>
    %120 = tpu.concatenate %60, %68, %76, %84, %87, %95, %103, %111, %119 in 0 : vector<4x512xf32>, vector<4x512xf32>, vector<4x512xf32>, vector<4x512xf32>, vector<4x512xf32>, vector<4x512xf32>, vector<4x512xf32>, vector<4x512xf32>, vector<4x512xf32> -> vector<36x512xf32>
    %c0_25 = arith.constant 0 : index
    %c0_26 = arith.constant 0 : index
    %121 = vector.load %arg2[%c0_25, %c0_26] : memref<8x36xf32, #tpu.memory_space<vmem>>, vector<8x36xf32>
    %cst_27 = arith.constant dense<0.000000e+00> : vector<8x512xf32>
    %122 = tpu.matmul %121, %120, %cst_27 {dimension_numbers = #tpu.dot_dimension_numbers<[1], [0], [0], [1], [0, 0, 1, 1], [], []>} : vector<8x36xf32>, vector<36x512xf32>, vector<8x512xf32> -> vector<8x512xf32>
    %c0_28 = arith.constant 0 : index
    %c0_29 = arith.constant 0 : index
    %123 = vector.load %arg3[%c0_28, %c0_29] : memref<8x1xf32, #tpu.memory_space<vmem>>, vector<8x1xf32>
    %124 = vector.broadcast %123 : vector<8x1xf32> to vector<8x512xf32>
    %125 = arith.addf %122, %124 : vector<8x512xf32>
    %cst_30 = arith.constant 0.000000e+00 : f32
    %126 = vector.broadcast %cst_30 : f32 to vector<8x512xf32>
    %127 = arith.maximumf %125, %126 : vector<8x512xf32>
    %128 = vector.extract_strided_slice %127 {offsets = [0, 0], sizes = [8, 256], strides = [1, 1]} : vector<8x512xf32> to vector<8x256xf32>
    %c0_31 = arith.constant 0 : index
    %c0_32 = arith.constant 0 : index
    %c0_33 = arith.constant 0 : index
    %129 = vector.load %arg4[%c0_31, %c0_32, %c0_33] : memref<2x8x256xf32, #tpu.memory_space<vmem>>, vector<1x8x256xf32>
    %130 = vector.shape_cast %129 : vector<1x8x256xf32> to vector<8x256xf32>
    %131 = vector.shape_cast %128 : vector<8x256xf32> to vector<1x8x256xf32>
    tpu.vector_store %arg4[%c0_31, %c0_32, %c0_33], %131 {strides = array<i32>} : memref<2x8x256xf32, #tpu.memory_space<vmem>>, vector<1x8x256xf32>,
    %132 = vector.extract_strided_slice %127 {offsets = [0, 256], sizes = [8, 256], strides = [1, 1]} : vector<8x512xf32> to vector<8x256xf32>
    %c1_34 = arith.constant 1 : index
    %c0_35 = arith.constant 0 : index
    %c0_36 = arith.constant 0 : index
    %133 = vector.load %arg4[%c1_34, %c0_35, %c0_36] : memref<2x8x256xf32, #tpu.memory_space<vmem>>, vector<1x8x256xf32>
    %134 = vector.shape_cast %133 : vector<1x8x256xf32> to vector<8x256xf32>
    %135 = vector.shape_cast %132 : vector<8x256xf32> to vector<1x8x256xf32>
    tpu.vector_store %arg4[%c1_34, %c0_35, %c0_36], %135 {strides = array<i32>} : memref<2x8x256xf32, #tpu.memory_space<vmem>>, vector<1x8x256xf32>,
    return
  }
  func.func @transform_0(%arg0: i32) -> (i32, i32, i32) {
    %c0_i32 = arith.constant 0 : i32
    %c0_i32_0 = arith.constant 0 : i32
    %c0_i32_1 = arith.constant 0 : i32
    return %arg0, %c0_i32, %c0_i32_0 : i32, i32, i32
  }
  func.func @transform_1(%arg0: i32) -> (i32, i32) {
    %c0_i32 = arith.constant 0 : i32
    %c0_i32_0 = arith.constant 0 : i32
    %c0_i32_1 = arith.constant 0 : i32
    return %c0_i32, %c0_i32_0 : i32, i32
  }
  func.func @transform_2(%arg0: i32) -> (i32, i32) {
    %c0_i32 = arith.constant 0 : i32
    %c0_i32_0 = arith.constant 0 : i32
    %c0_i32_1 = arith.constant 0 : i32
    return %c0_i32, %c0_i32_0 : i32, i32
  }
  func.func @transform_3(%arg0: i32) -> (i32, i32, i32) {
    %c0_i32 = arith.constant 0 : i32
    %c0_i32_0 = arith.constant 0 : i32
    %c0_i32_1 = arith.constant 0 : i32
    return %arg0, %c0_i32, %c0_i32_0 : i32, i32, i32
  }
}

</mosaic_0001>

<bundles_post_ra>
// kernel: dilated_layer_forward.1
= control target key start
LH: loop header
LB: loop body
LE: loop exit
PB: predicated region body
PF: predicated region fallthrough
CT: control target
= control target key end

     0   :  { %s621_s16 = smov 96   ;;  %s622_s17 = smov 94   ;;  %v14_v19 = vlaneseq  ;;  %vm295_vm1 = vcmask 769024   ;;  %vm362_vm5 = vcmask 1043456   ;;  %vm924_vm6 = vcmask 1031168   ;;  %s919_s0 = inlined_call_operand.vmem [shape: f32[2,4,256], index: 0, kind: input, shape index: {}]   ;;  %s920_s2 = inlined_call_operand.vmem [shape: f32[8,1], index: 2, kind: input, shape index: {}]   ;;  %s921_s1 = inlined_call_operand.vmem [shape: f32[8,36], index: 1, kind: input, shape index: {}]   ;;  %s922_s3 = inlined_call_operand.vmem [shape: f32[2,8,256], index: 3, kind: output, shape index: {}]  }
   0x1   :  { %v77_v0 = vld [vmem:[%s919_s0] sm:$0xff]  ;;  %v495_v3 = vld [vmem:[%s919_s0 + $0x8] sm:$0xff]  ;;  %s623_s0 = smov 126   ;;  %s624_s18 = smov 98   ;;  %vm268_vm7 = vcmask 785408   ;;  %vm925_vm9 = vcmask 801792  }
   0x2   :  { %79 = vst [vmem:[#allocation1] ss:$2 sm:$0xff] %v77_v0  ;;  %s625_s19 = smov 2   ;;  %s626_s20 = smov 32   ;;  %v688_v21 = vand.u32 127, %v14_v19  ;;  %vm187_vm12 = vcmask 15360  }
   0x3   :  { %s627_s21 = smov 30   ;;  %s628_s22 = smov 34   ;;  %vm923_vm14 = vcmask 244736  }
   0x4   :  { %v691_v22 = vadd.s32 128, %v688_v21  ;;  %v21_v27 = vand.u32 15, %v688_v21  ;;  %vm41_vm13 = vcmp.ge.s32.totalorder %v688_v21, 32 }
   0x6   :  { %v28_v24 = vand.u32 15, %v691_v22  ;;  %vm56_vm2 = vcmp.lt.s32.totalorder %v691_v22, 224  ;;  %vm702_vm3 = vcmp.lt.s32.totalorder %v21_v27, 14  ;;  %vm739_vm10 = vcmp.ge.s32.totalorder %v21_v27, 2 }
   0x7   :  { %vm786_vm15 = vmand %vm41_vm13, %vm702_vm3 }
   0x8   :  { %vm697_vm0 = vcmp.lt.s32.totalorder %v28_v24, 14  ;;  %vm727_vm8 = vcmp.ge.s32.totalorder %v28_v24, 2 }
   0x9   :  { %v653_v1 = vld.sshfl [vmem:[#allocation1] sm:$0xff pattern:$0x75316420]  ;;  %v655_v2 = vld.sshfl [vmem:[#allocation1 + $0x8] sm:$0xff pattern:$0x75316420]  ;;  %vm710_vm4 = vmand %vm56_vm2, %vm697_vm0 }
   0xa   :  { %84 = vst [vmem:[#allocation1] ss:$2 sm:$0xff] %v77_v0  ;;  %vm747_vm11 = vmand %vm56_vm2, %vm727_vm8 }
  0x11   :  { %v85_v4 = vld.sshfl [vmem:[#allocation1] sm:$0xff pattern:$0x75316420]  ;;  %v86_v5 = vld.sshfl [vmem:[#allocation1 + $0x8] sm:$0xff pattern:$0x75316420] }
  0x12   :  { %v515_v6 = vpack.i.bf16 %v653_v1, %v85_v4  ;;  %90 = vst [vmem:[#allocation1] ss:$2 sm:$0xff] %v495_v3  ;;  %v610_v16 = vpack.i.bf16 %v86_v5, %v85_v4  ;;  %v595_v17 = vpack.i.bf16 %v85_v4, %v655_v2 }
  0x14   :  { %516 = vrot.lane.b32.xlu2 %v515_v6, %s621_s16 }
  0x19   :  { %v661_v7 = vld.sshfl [vmem:[#allocation1] sm:$0xff pattern:$0x75316420]  ;;  %v663_v8 = vld.sshfl [vmem:[#allocation1 + $0x8] sm:$0xff pattern:$0x75316420] }
  0x1a   :  { %302 = vrot.lane.b32.xlu1 %v661_v7, %s622_s17  ;;  %95 = vst [vmem:[#allocation1] ss:$2 sm:$0xff] %v495_v3  ;;  %v525_v9 = vpack.i.bf16 %v663_v8, %v661_v7  ;;  %v520_v10 = vpack.i.bf16 %v655_v2, %v661_v7 }
  0x1c   :  { %526 = vrot.lane.b32.xlu2 %v525_v9, %s623_s0  ;;  %521 = vrot.lane.b32.xlu0 %v520_v10, %s621_s16 }
  0x21   :  { %v96_v11 = vld.sshfl [vmem:[#allocation1] sm:$0xff pattern:$0x75316420]  ;;  %v97_v14 = vld.sshfl [vmem:[#allocation1 + $0x8] sm:$0xff pattern:$0x75316420] }
  0x22   :  { %304 = vrot.lane.b32.xlu1 %v663_v8, %s622_s17  ;;  %v535_v12 = vpack.i.bf16 %v96_v11, %v663_v8  ;;  %v545_v13 = vpack.i.bf16 %v653_v1, %v96_v11  ;;  %v555_v15 = vpack.i.bf16 %v655_v2, %v97_v14 }
  0x24   :  { %306 = vrot.lane.b32.xlu2 %v96_v11, %s622_s17  ;;  %536 = vrot.lane.b32.xlu0 %v535_v12, %s621_s16 }
  0x2a   :  { %531 = vrot.lane.b32.xlu1 %v525_v9, %s624_s18 }
  0x2c   :  { %546 = vrot.lane.b32.xlu2 %v545_v13, %s624_s18  ;;  %541 = vrot.lane.b32.xlu0 %v545_v13, %s623_s0 }
  0x32   :  { %556 = vrot.lane.b32.xlu1 %v555_v15, %s625_s19 }
  0x34   :  { %561 = vrot.lane.b32.xlu2 %v535_v12, %s626_s20  ;;  %551 = vrot.lane.b32.xlu0 %v535_v12, %s625_s19 }
  0x3a   :  { %571 = vrot.lane.b32.xlu1 %v555_v15, %s627_s21 }
  0x3c   :  { %291 = vrot.lane.b32.xlu2 %v655_v2, %s622_s17  ;;  %566 = vrot.lane.b32.xlu0 %v535_v12, %s627_s21 }
  0x42   :  { %289 = vrot.lane.b32.xlu1 %v653_v1, %s622_s17 }
  0x44   :  { %586 = vrot.lane.b32.xlu2 %v555_v15, %s628_s22  ;;  %576 = vrot.lane.b32.xlu0 %v555_v15, %s626_s20 }
  0x4a   :  { %581 = vrot.lane.b32.xlu1 %v535_v12, %s628_s22 }
  0x4c   :  { %601 = vrot.lane.b32.xlu2 %v610_v16, %s625_s19  ;;  %293 = vrot.lane.b32.xlu0 %v85_v4, %s622_s17 }
  0x52   :  { %596 = vrot.lane.b32.xlu1 %v595_v17, %s624_s18 }
  0x54   :  { %591 = vrot.lane.b32.xlu0 %v595_v17, %s623_s0  ;;  %616 = vrot.lane.b32.xlu2 %v610_v16, %s628_s22 }
  0x5a   :  { %611 = vrot.lane.b32.xlu1 %v610_v16, %s627_s21 }
  0x5c   :  { %606 = vrot.lane.b32.xlu0 %v610_v16, %s626_s20 }
  0x6e   :  { %v686_v18 = vpop.permute.xlu2 %516 }
  0x76   :  { %v527_v20 = vpop.permute.xlu2 %526 }
  0x77   :  { %v529_v32 = vunpack.i.h.bf16 %v527_v20  ;;  %v528_v33 = vunpack.i.l.bf16 %v527_v20 }
  0x79   :  { %v227_v42 = vsel %vm924_vm6, %v528_v33, %v529_v32 }
  0x7a   :  { %v231_v48 = vsel %vm702_vm3, %v227_v42, 0.0 }
  0x7b   :  { %v344_v57 = vrot.slane %v231_v48, 4 }
  0x7d   :  { %v373_v11 = vsel %vm362_vm5, %v661_v7, %v344_v57  ;;  %v518_v57 = vunpack.i.l.bf16 %v686_v18 }
  0x7e   :  { %v307_v25 = vpop.permute.xlu2 %306 }
  0x86   :  { %v720_v39 = vpop.permute.xlu2 %546 }
  0x87   :  { %v548_v46 = vunpack.i.l.bf16 %v720_v39 }
  0x8c   :  { %v303_v23 = vpop.permute.xlu1 %302 }
  0x8e   :  { %v694_v26 = vpop.permute.xlu0 %521  ;;  %v754_v62 = vpop.permute.xlu2 %561 }
  0x8f   :  { %v523_v44 = vunpack.i.l.bf16 %v694_v26  ;;  %v564_v42 = vunpack.i.h.bf16 %v754_v62 }
  0x94   :  { %v305_v31 = vpop.permute.xlu1 %304 }
  0x95   :  { %v308_v34 = vsel %vm295_vm1, %v303_v23, %v305_v31  ;;  %v309_v35 = vsel %vm295_vm1, %v305_v31, %v307_v25 }
  0x96   :  { %v537_v36 = vpop.permute.xlu0 %536  ;;  %v312_v37 = vsel %vm702_vm3, %v308_v34, 0.0  ;;  %v313_v38 = vsel %vm710_vm4, %v309_v35, 0.0  ;;  %v292_v17 = vpop.permute.xlu2 %291 }
  0x97   :  { %v539_v40 = vunpack.i.h.bf16 %v537_v36  ;;  %v538_v41 = vunpack.i.l.bf16 %v537_v36  ;;  %500 = vmatpush.msk.msra.mxu2 %vm362_vm5, %v312_v37  ;;  %502 = vmatpush.msk.msra.mxu3 %vm362_vm5, %v313_v38 }
  0x99   :  { %v282_v43 = vsel %vm268_vm7, %v538_v41, %v539_v40  ;;  %v281_v51 = vsel %vm268_vm7, %v523_v44, %v538_v41 }
  0x9a   :  { %v286_v52 = vsel %vm56_vm2, %v282_v43, 0.0  ;;  %v356_v59 = vrot.slane %v281_v51, 4  ;;  %v563_v43 = vunpack.i.l.bf16 %v754_v62 }
  0x9b   :  { %v357_v61 = vrot.slane %v286_v52, 4 }
  0x9c   :  { %v532_v47 = vpop.permute.xlu1 %531 }
  0x9d   :  { %v534_v49 = vunpack.i.h.bf16 %v532_v47  ;;  %v533_v50 = vunpack.i.l.bf16 %v532_v47 }
  0x9e   :  { %v737_v53 = vpop.permute.xlu0 %541 }
  0x9f   :  { %v543_v56 = vunpack.i.l.bf16 %v737_v53  ;;  %v254_v58 = vsel %vm925_vm9, %v533_v50, %v534_v49  ;;  %v255_v60 = vsel %vm925_vm9, %v534_v49, %v548_v46  ;;  %v800_v46 = vpop.permute.xlu2 %586  ;;  %v380_v50 = vld [vmem:[%s920_s2] sm:$0xff]  ;;  %vm823_vm9 = vmand %vm41_vm13, %vm739_vm10 }
  0xa0   :  { %v258_v63 = vsel %vm739_vm10, %v254_v58, 0.0  ;;  %v259_v0 = vsel %vm747_vm11, %v255_v60, 0.0  ;;  %v524_v58 = vunpack.i.h.bf16 %v694_v26  ;;  %v519_v26 = vunpack.i.h.bf16 %v686_v18 }
  0xa1   :  { %v228_v3 = vsel %vm924_vm6, %v529_v32, %v543_v56  ;;  %v377_v4 = vsel %vm362_vm5, %v258_v63, %v356_v59  ;;  %v378_v5 = vsel %vm362_vm5, %v259_v0, %v357_v61  ;;  %v629_v56 = vmov 0  }
  0xa2   :  { %v232_v6 = vsel %vm697_vm0, %v228_v3, 0.0  ;;  %454 = vmatpush.msra.mxu2 %v377_v4  ;;  %474 = vmatpush.msra.mxu3 %v378_v5  ;;  %v588_v59 = vunpack.i.l.bf16 %v800_v46  ;;  %vm106_vm6 = vcmask 277504  }
  0xa3   :  { %v345_v9 = vrot.slane %v232_v6, 4  ;;  %620 = vset.pattern.permute.xlu0 %v629_v56  ;;  %v270_v6 = vsel %vm268_vm7, %v524_v58, %v518_v57 }
  0xa4   :  { %v765_v10 = vpop.permute.xlu1 %556  ;;  %455 = vmatpush.msra.mxu2 %v373_v11  ;;  %383 = vperm.xlu0 %620, %v380_v50  }
  0xa5   :  { %v374_v12 = vsel %vm362_vm5, %v663_v8, %v345_v9  ;;  %v558_v14 = vunpack.i.l.bf16 %v765_v10  ;;  %v559_v30 = vunpack.i.h.bf16 %v765_v10 }
  0xa6   :  { %v552_v13 = vpop.permute.xlu0 %551  ;;  %475 = vmatpush.msra.mxu3 %v374_v12 }
  0xa7   :  { %v554_v15 = vunpack.i.h.bf16 %v552_v13  ;;  %v553_v16 = vunpack.i.l.bf16 %v552_v13  ;;  %v602_v9 = vpop.permute.xlu2 %601 }
  0xa9   :  { %v200_v19 = vsel %vm187_vm12, %v553_v16, %v554_v15  ;;  %v201_v20 = vsel %vm187_vm12, %v554_v15, %v558_v14 }
  0xaa   :  { %v204_v8 = vsel %vm739_vm10, %v200_v19, 0.0  ;;  %v205_v25 = vsel %vm727_vm8, %v201_v20, 0.0  ;;  %v841_v19 = vld [vmem:[%s921_s1] sm:$0xff] }
  0xab   :  { %v332_v34 = vrot.slane %v204_v8, 4  ;;  %v333_v36 = vrot.slane %v205_v25, 4  ;;  %v274_v8 = vsel %vm56_vm2, %v270_v6, 0.0  ;;  %v604_v25 = vunpack.i.h.bf16 %v602_v9 }
  0xac   :  { %v774_v23 = vpop.permute.xlu1 %571  ;;  %vm943_vm2 = vcmask 801792  }
  0xad   :  { %v573_v7 = vunpack.i.l.bf16 %v774_v23 }
  0xae   :  { %v567_v24 = vpop.permute.xlu0 %566 }
  0xaf   :  { %v569_v27 = vunpack.i.h.bf16 %v567_v24  ;;  %v568_v31 = vunpack.i.l.bf16 %v567_v24  ;;  %v269_v24 = vsel %vm268_vm7, %v519_v26, %v524_v58  ;;  %vm945_vm7 = vcmask 1031168  }
  0xb1   :  { %v173_v33 = vsel %vm923_vm14, %v568_v31, %v569_v27  ;;  %v174_v35 = vsel %vm923_vm14, %v569_v27, %v573_v7  ;;  %vm133_vm14 = vcmask 261120   ;;  %v603_v7 = vunpack.i.l.bf16 %v602_v9 }
  0xb2   :  { %v177_v37 = vsel %vm786_vm15, %v173_v33, 0.0  ;;  %v178_v38 = vsel %vm697_vm0, %v174_v35, 0.0  ;;  %v146_v52 = vsel %vm133_vm14, %v563_v43, %v564_v42  ;;  %v549_v31 = vunpack.i.h.bf16 %v720_v39 }
  0xb3   :  { %v369_v40 = vsel %vm362_vm5, %v177_v37, %v332_v34  ;;  %v370_v41 = vsel %vm362_vm5, %v178_v38, %v333_v36  ;;  %v150_v60 = vsel %vm41_vm13, %v146_v52, 0.0  ;;  %v544_v34 = vunpack.i.h.bf16 %v737_v53  ;;  %v617_v38 = vpop.permute.xlu2 %616 }
  0xb4   :  { %v290_v44 = vpop.permute.xlu1 %289  ;;  %456 = vmatpush.msra.mxu2 %v369_v40  ;;  %476 = vmatpush.msra.mxu3 %v370_v41  ;;  %v320_v5 = vrot.slane %v150_v60, 4  ;;  %v354_v36 = vrot.slane %v269_v24, 4  ;;  %v355_v37 = vrot.slane %v274_v8, 4  ;;  %v188_v22 = vsel %vm187_vm12, %v559_v30, %v603_v7 }
  0xb5   :  { %v296_v47 = vsel %vm295_vm1, %v290_v44, %v292_v17  ;;  %v619_v44 = vunpack.i.h.bf16 %v617_v38  ;;  %v189_v53 = vsel %vm187_vm12, %v603_v7, %v604_v25  ;;  %v618_v56 = vunpack.i.l.bf16 %v617_v38 }
  0xb6   :  { %v803_v48 = vpop.permute.xlu0 %576  ;;  %v300_v49 = vsel %vm702_vm3, %v296_v47, 0.0  ;;  %v192_v60 = vsel %vm739_vm10, %v188_v22, 0.0 }
  0xb7   :  { %496 = vmatpush.msk.msra.mxu0 %vm362_vm5, %v300_v49  ;;  %v578_v51 = vunpack.i.l.bf16 %v803_v48  ;;  %v108_v26 = vsel %vm106_vm6, %v618_v56, %v619_v44  ;;  %v579_v54 = vunpack.i.h.bf16 %v803_v48 }
  0xb9   :  { %v147_v62 = vsel %vm133_vm14, %v564_v42, %v578_v51 }
  0xba   :  { %v321_v14 = vrot.slane %v147_v62, 4  ;;  %v589_v62 = vunpack.i.h.bf16 %v800_v46 }
  0xbc   :  { %v582_v61 = vpop.permute.xlu1 %581  ;;  %v107_v48 = vsel %vm106_vm6, %v589_v62, %v618_v56 }
  0xbd   :  { %v584_v63 = vunpack.i.h.bf16 %v582_v61  ;;  %v583_v0 = vunpack.i.l.bf16 %v582_v61  ;;  %v193_v61 = vsel %vm727_vm8, %v189_v53, 0.0  ;;  %v111_v7 = vsel %vm823_vm9, %v107_v48, 0.0 }
  0xbe   :  { %v294_v4 = vpop.permute.xlu0 %293  ;;  %v331_v46 = vrot.slane %v193_v61, 4 }
  0xbf   :  { %v297_v11 = vsel %vm295_vm1, %v292_v17, %v294_v4  ;;  %v119_v12 = vsel %vm106_vm6, %v583_v0, %v584_v63  ;;  %v120_v13 = vsel %vm106_vm6, %v584_v63, %v588_v59  ;;  %vm926_vm1 = vcmask 293888  }
  0xc0   :  { %v301_v15 = vsel %vm710_vm4, %v297_v11, 0.0  ;;  %v123_v16 = vsel %vm823_vm9, %v119_v12, 0.0  ;;  %v124_v18 = vsel %vm727_vm8, %v120_v13, 0.0  ;;  %vm944_vm4 = vmmov %vm943_vm2  ;;  %v574_v63 = vunpack.i.h.bf16 %v774_v23 }
  0xc1   :  { %498 = vmatpush.msk.msra.mxu1 %vm362_vm5, %v301_v15  ;;  %v365_v17 = vsel %vm362_vm5, %v123_v16, %v320_v5  ;;  %v366_v20 = vsel %vm362_vm5, %v124_v18, %v321_v14  ;;  %v330_v11 = vrot.slane %v192_v60, 4 }
  0xc2   :  { %457 = vmatpush.msra.mxu2 %v365_v17  ;;  %477 = vmatpush.msra.mxu3 %v366_v20 }
  0xc3   :  { %501 = vmatmul.msk.f32.vlgmr.msra.gmra.mxu2 %vm926_vm1, %v841_v19  ;;  %503 = vmatmul.msk.f32.vlgmr.msra.gmra.mxu3 %vm926_vm1, %v841_v19  ;;  %vm946_vm1 = vmmov %vm945_vm7 }
  0xc4   :  { %v597_v27 = vpop.permute.xlu1 %596 }
  0xc5   :  { %v599_v33 = vunpack.i.h.bf16 %v597_v27  ;;  %v598_v10 = vunpack.i.l.bf16 %v597_v27 }
  0xc6   :  { %v592_v35 = vpop.permute.xlu0 %591 }
  0xc7   :  { %v594_v40 = vunpack.i.h.bf16 %v592_v35  ;;  %v593_v41 = vunpack.i.l.bf16 %v592_v35  ;;  %v242_v42 = vsel %vm943_vm2, %v549_v31, %v598_v10  ;;  %v243_v43 = vsel %vm944_vm4, %v598_v10, %v599_v33 }
  0xc8   :  { %v246_v39 = vsel %vm739_vm10, %v242_v42, 0.0  ;;  %v247_v47 = vsel %vm747_vm11, %v243_v43, 0.0 }
  0xc9   :  { %v375_v49 = vsel %vm362_vm5, %v246_v39, %v354_v36  ;;  %v376_v50 = vsel %vm362_vm5, %v247_v47, %v355_v37  ;;  %v215_v51 = vsel %vm945_vm7, %v544_v34, %v593_v41  ;;  %v216_v52 = vsel %vm946_vm1, %v593_v41, %v594_v40 }
  0xca   :  { %414 = vmatpush.msra.mxu0 %v375_v49  ;;  %434 = vmatpush.msra.mxu1 %v376_v50  ;;  %v219_v57 = vsel %vm702_vm3, %v215_v51, 0.0  ;;  %v220_v55 = vsel %vm697_vm0, %v216_v52, 0.0  ;;  %vm947_vm3 = vcmask 244736  }
  0xcb   :  { %v342_v58 = vrot.slane %v219_v57, 4  ;;  %v343_v59 = vrot.slane %v220_v55, 4  ;;  %vm948_vm10 = vmmov %vm947_vm3 }
  0xcc   :  { %v612_v0 = vpop.permute.xlu1 %611 }
  0xcd   :  { %v614_v29 = vunpack.i.h.bf16 %v612_v0  ;;  %v613_v4 = vunpack.i.l.bf16 %v612_v0  ;;  %v371_v5 = vsel %vm362_vm5, %v653_v1, %v342_v58  ;;  %v372_v6 = vsel %vm362_vm5, %v655_v2, %v343_v59 }
  0xce   :  { %v607_v9 = vpop.permute.xlu0 %606  ;;  %415 = vmatpush.msra.mxu0 %v371_v5  ;;  %435 = vmatpush.msra.mxu1 %v372_v6  ;;  %v112_v2 = vsel %vm727_vm8, %v108_v26, 0.0 }
  0xcf   :  { %v609_v12 = vunpack.i.h.bf16 %v607_v9  ;;  %v608_v23 = vunpack.i.l.bf16 %v607_v9  ;;  %v161_v13 = vsel %vm947_vm3, %v574_v63, %v613_v4  ;;  %v162_v14 = vsel %vm948_vm10, %v613_v4, %v614_v29 }
  0xd0   :  { %v165_v15 = vsel %vm786_vm15, %v161_v13, 0.0  ;;  %v166_v1 = vsel %vm697_vm0, %v162_v14, 0.0  ;;  %vm949_vm0 = vcmask 293888  }
  0xd1   :  { %v367_v16 = vsel %vm362_vm5, %v165_v15, %v330_v11  ;;  %v368_v18 = vsel %vm362_vm5, %v166_v1, %v331_v46  ;;  %v135_v17 = vsel %vm133_vm14, %v608_v23, %v609_v12  ;;  %v134_v20 = vsel %vm133_vm14, %v579_v54, %v608_v23  ;;  %vm950_vm6 = vmmov %vm949_vm0 }
  0xd2   :  { %416 = vmatpush.msra.mxu0 %v367_v16  ;;  %436 = vmatpush.msra.mxu1 %v368_v18  ;;  %v319_v32 = vrot.slane %v135_v17, 4  ;;  %v138_v28 = vsel %vm41_vm13, %v134_v20, 0.0 }
  0xd3   :  { %v318_v30 = vrot.slane %v138_v28, 4 }
  0xd4   :  { %v364_v45 = vsel %vm362_vm5, %v112_v2, %v319_v32 }
  0xd5   :  { %437 = vmatpush.msra.mxu1 %v364_v45  ;;  %v363_v24 = vsel %vm362_vm5, %v111_v7, %v318_v30 }
  0xd6   :  { %417 = vmatpush.msra.mxu0 %v363_v24  ;;  %499 = vmatmul.msk.f32.vlgmr.msra.gmra.mxu1 %vm949_vm0, %v841_v19 }
  0xd7   :  { %497 = vmatmul.msk.f32.vlgmr.msra.gmra.mxu0 %vm950_vm6, %v841_v19 }
 0x116   :  { %v384_v8 = vpop.permute.xlu0 %383 }
 0x146   :  { %v459_v25 = vpop.f32.mrf.mxu2  ;;  %v479_v21 = vpop.f32.mrf.mxu3 }
 0x147   :  { %v460_v27 = vadd.f32 %v459_v25, %v384_v8  ;;  %v480_v31 = vadd.f32 %v479_v21, %v384_v8 }
 0x149   :  { %v484_v33 = vmax.f32 %v460_v27, 0.0  ;;  %v485_v10 = vmax.f32 %v480_v31, 0.0 }
 0x14b   :  { %504 = vst [vmem:[%s922_s3 + $0x10] sm:$0xff] %v484_v33 }
 0x14c   :  { %505 = vst [vmem:[%s922_s3 + $0x18] sm:$0xff] %v485_v10 }
 0x153   :  { %v439_v3 = vpop.f32.mrf.mxu1 }
 0x154   :  { %v419_v34 = vpop.f32.mrf.mxu0  ;;  %v440_v35 = vadd.f32 %v439_v3, %v384_v8 }
 0x155   :  { %v420_v36 = vadd.f32 %v419_v34, %v384_v8 }
 0x156   :  { %v483_v19 = vmax.f32 %v440_v35, 0.0 }
 0x157   :  { %v482_v37 = vmax.f32 %v420_v36, 0.0 }
 0x158   :  { %487 = vst [vmem:[%s922_s3 + $0x8] sm:$0xff] %v483_v19 }
 0x159   :  { %486 = vst [vmem:[%s922_s3] sm:$0xff] %v482_v37 }

</bundles_post_ra>
